<compile_context>
chip_gen: v7x
topology: tpu7x:2x2x1
jax: 0.10.0
libtpu: 0.0.40
codegen_flags: <defaults>
</compile_context>

<pallas_src>
import functools

import jax
import jax.numpy as jnp
from jax.experimental import pallas as pl
from jax.experimental.pallas import tpu as pltpu


def _round_up(x: int, m: int) -> int:
    return ((x + m - 1) // m) * m


def _logit_matmul_kernel(x_ref, w_ref, o_ref, acc_ref):
    """One (tm, tn) output tile; grid axis 2 loops over K chunks (innermost)."""
    @pl.when(pl.program_id(2) == 0)
    def _():
        acc_ref[...] = jnp.zeros_like(acc_ref)

    # x_ref: (tm, tk), w_ref: (tk, tn)  -> canonical MXU contraction, f32 acc.
    acc_ref[...] += jnp.dot(
        x_ref[...], w_ref[...], preferred_element_type=jnp.float32
    )

    @pl.when(pl.program_id(2) == pl.num_programs(2) - 1)
    def _():
        o_ref[...] = acc_ref[...].astype(o_ref.dtype)


@functools.partial(jax.jit, static_argnames=("tm", "tn", "tk"))
def logit_forward(hidden_state, weight, *, tm=None, tn=None, tk=None):
    """Pallas equivalent of LinearWithGradAccumulationAndAsyncCommunication fwd.

    hidden_state: (seq, batch, hidden)   dtype bf16/f32
    weight:       (vocab_partition, hidden)
    returns:      (seq, batch, vocab_partition)
    """
    S, B, K = hidden_state.shape
    N, Kw = weight.shape
    assert K == Kw, "hidden dims must match"
    M = S * B

    # ---- Tile selection -----------------------------------------------------
    # Defaults: MXU-friendly 256-aligned tn/tk (also fine for v5e's 128 MXU),
    # tm as large as reasonable to minimize weight re-streaming from HBM.
    # Small problems shrink tiles to the (aligned) problem size to avoid
    # gratuitous padding.  All choices keep the double-buffered working set
    # (~10 MiB at full defaults in bf16) well inside v7x's 64 MiB VMEM.
    tm = tm or min(512, _round_up(M, 16))    # sublane dim (bf16 packs 16 rows)
    tn = tn or min(1024, _round_up(N, 256))  # lane dim, 256-aligned for MXU
    tk = tk or min(1024, _round_up(K, 256))  # contraction chunk, 256-aligned

    # ---- Pad to tile multiples (no divisibility requirement) ----------------
    Mp = _round_up(M, tm)
    Np = _round_up(N, tn)
    Kp = _round_up(K, tk)

    x2d = hidden_state.reshape(M, K)
    w_t = weight.T  # one-time HBM-side transpose -> (K, N)

    if (Mp, Kp) != (M, K):
        x2d = jnp.pad(x2d, ((0, Mp - M), (0, Kp - K)))
    if (Kp, Np) != (K, N):
        w_t = jnp.pad(w_t, ((0, Kp - K), (0, Np - N)))

    itemsize = jnp.dtype(hidden_state.dtype).itemsize
    cost = pl.CostEstimate(
        flops=2 * Mp * Np * Kp,
        transcendentals=0,
        bytes_accessed=(Mp * Kp + Kp * Np + Mp * Np) * itemsize,
    )

    out2d = pl.pallas_call(
        _logit_matmul_kernel,
        out_shape=jax.ShapeDtypeStruct((Mp, Np), hidden_state.dtype),
        grid_spec=pltpu.PrefetchScalarGridSpec(
            num_scalar_prefetch=0,
            grid=(Mp // tm, Np // tn, Kp // tk),
            in_specs=[
                pl.BlockSpec((tm, tk), lambda i, j, k: (i, k)),   # activations
                pl.BlockSpec((tk, tn), lambda i, j, k: (k, j)),   # weight (K,N)
            ],
            out_specs=pl.BlockSpec((tm, tn), lambda i, j, k: (i, j)),
            scratch_shapes=[pltpu.VMEM((tm, tn), jnp.float32)],
        ),
        compiler_params=pltpu.CompilerParams(
            dimension_semantics=("parallel", "parallel", "arbitrary"),
            vmem_limit_bytes=48 * 1024 * 1024,
        ),
        cost_estimate=cost,
    )(x2d, w_t)

    # Strip padding, restore (seq, batch, vocab_partition).
    return out2d[:M, :N].reshape(S, B, N)


if __name__ == "__main__":
    # Small, module-consistent synthetic config:
    #   micro_batch=2, seq_length=8, hidden_size=32,
    #   padded_vocab_size=128, tensor_model_parallel_size=2
    #   -> output_size_per_partition = 64
    seq_len = 8
    micro_batch = 2
    hidden_size = 32
    vocab_partition = 64
    dtype = jnp.bfloat16

    key = jax.random.PRNGKey(0)
    k_x, k_w = jax.random.split(key)

    hidden_state = jax.random.normal(
        k_x, (seq_len, micro_batch, hidden_size), dtype=jnp.float32
    ).astype(dtype)
    # torch.rand -> uniform [0, 1); deterministic synthetic init here.
    word_embeddings_weight = jax.random.uniform(
        k_w, (vocab_partition, hidden_size), dtype=jnp.float32
    ).astype(dtype)

    out = logit_forward(hidden_state, word_embeddings_weight)
    out = jax.block_until_ready(out)

    # Reference check in plain JAX (fp32 accumulate, same as kernel).
    ref = jnp.einsum(
        "sbh,vh->sbv",
        hidden_state.astype(jnp.float32),
        word_embeddings_weight.astype(jnp.float32),
    ).astype(dtype)
    assert out.shape == (seq_len, micro_batch, vocab_partition)
    assert out.dtype == dtype
    assert jnp.allclose(
        out.astype(jnp.float32), ref.astype(jnp.float32), atol=1e-2, rtol=1e-2
    )

    # TODO(synk): cuda_timing_decorator returns (output, elapsed_ms); timing is
    # host-side instrumentation, not kernel compute, so only the output is produced.
    print("KERNEL_OK")
</pallas_src>

<mosaic_0001>
module attributes {stable_mosaic.version = 11 : i64} {
  func.func @_logit_matmul_kernel(%arg0: i32, %arg1: i32, %arg2: i32, %arg3: memref<16x256xbf16, #tpu.memory_space<vmem>>, %arg4: memref<256x256xbf16, #tpu.memory_space<vmem>>, %arg5: memref<16x256xbf16, #tpu.memory_space<vmem>>, %arg6: memref<16x256xf32, #tpu.memory_space<vmem>>) attributes {dimension_semantics = [#tpu.dimension_semantics<parallel>, #tpu.dimension_semantics<parallel>, #tpu.dimension_semantics<arbitrary>], iteration_bounds = array<i64: 1, 1, 1>, scalar_prefetch = 0 : i64, scratch_operands = 1 : i64, tpu.core_type = #tpu.core_type<tc>, window_params = [{transform_indices = @transform_0, window_bounds = array<i64: 16, 256>}, {transform_indices = @transform_1, window_bounds = array<i64: 256, 256>}, {transform_indices = @transform_2, window_bounds = array<i64: 16, 256>}]} {
    %c0_i32 = arith.constant 0 : i32
    %0 = arith.cmpi eq, %arg2, %c0_i32 : i32
    %1 = arith.extui %0 : i1 to i32
    %c0_i32_0 = arith.constant 0 : i32
    %2 = arith.cmpi ne, %1, %c0_i32_0 : i32
    scf.if %2 {
      %cst_10 = arith.constant 0.000000e+00 : f32
      %12 = vector.broadcast %cst_10 : f32 to vector<16x256xf32>
      %c0_11 = arith.constant 0 : index
      %c0_12 = arith.constant 0 : index
      %13 = vector.load %arg6[%c0_11, %c0_12] : memref<16x256xf32, #tpu.memory_space<vmem>>, vector<16x256xf32>
      tpu.vector_store %arg6[%c0_11, %c0_12], %12 {strides = array<i32>} : memref<16x256xf32, #tpu.memory_space<vmem>>, vector<16x256xf32>,
    } else {
    }
    %c0 = arith.constant 0 : index
    %c0_1 = arith.constant 0 : index
    %3 = vector.load %arg6[%c0, %c0_1] : memref<16x256xf32, #tpu.memory_space<vmem>>, vector<16x256xf32>
    %c0_2 = arith.constant 0 : index
    %c0_3 = arith.constant 0 : index
    %4 = vector.load %arg3[%c0_2, %c0_3] : memref<16x256xbf16, #tpu.memory_space<vmem>>, vector<16x256xbf16>
    %c0_4 = arith.constant 0 : index
    %c0_5 = arith.constant 0 : index
    %5 = vector.load %arg4[%c0_4, %c0_5] : memref<256x256xbf16, #tpu.memory_space<vmem>>, vector<256x256xbf16>
    %cst = arith.constant dense<0.000000e+00> : vector<16x256xf32>
    %6 = tpu.matmul %4, %5, %cst {dimension_numbers = #tpu.dot_dimension_numbers<[1], [0], [0], [1], [0, 0, 1, 1], [], []>} : vector<16x256xbf16>, vector<256x256xbf16>, vector<16x256xf32> -> vector<16x256xf32>
    %7 = arith.addf %3, %6 : vector<16x256xf32>
    %c0_6 = arith.constant 0 : index
    %c0_7 = arith.constant 0 : index
    %8 = vector.load %arg6[%c0_6, %c0_7] : memref<16x256xf32, #tpu.memory_space<vmem>>, vector<16x256xf32>
    tpu.vector_store %arg6[%c0_6, %c0_7], %7 {strides = array<i32>} : memref<16x256xf32, #tpu.memory_space<vmem>>, vector<16x256xf32>,
    %c0_i32_8 = arith.constant 0 : i32
    %9 = arith.cmpi eq, %arg2, %c0_i32_8 : i32
    %10 = arith.extui %9 : i1 to i32
    %c0_i32_9 = arith.constant 0 : i32
    %11 = arith.cmpi ne, %10, %c0_i32_9 : i32
    scf.if %11 {
      %c0_10 = arith.constant 0 : index
      %c0_11 = arith.constant 0 : index
      %12 = vector.load %arg6[%c0_10, %c0_11] : memref<16x256xf32, #tpu.memory_space<vmem>>, vector<16x256xf32>
      %13 = arith.truncf %12 : vector<16x256xf32> to vector<16x256xbf16>
      %c0_12 = arith.constant 0 : index
      %c0_13 = arith.constant 0 : index
      %14 = vector.load %arg5[%c0_12, %c0_13] : memref<16x256xbf16, #tpu.memory_space<vmem>>, vector<16x256xbf16>
      tpu.vector_store %arg5[%c0_12, %c0_13], %13 {strides = array<i32>} : memref<16x256xbf16, #tpu.memory_space<vmem>>, vector<16x256xbf16>,
    } else {
    }
    return
  }
  func.func @transform_0(%arg0: i32, %arg1: i32, %arg2: i32) -> (i32, i32) {
    %c0_i32 = arith.constant 0 : i32
    return %arg0, %arg2 : i32, i32
  }
  func.func @transform_1(%arg0: i32, %arg1: i32, %arg2: i32) -> (i32, i32) {
    %c0_i32 = arith.constant 0 : i32
    return %arg2, %arg1 : i32, i32
  }
  func.func @transform_2(%arg0: i32, %arg1: i32, %arg2: i32) -> (i32, i32) {
    %c0_i32 = arith.constant 0 : i32
    return %arg0, %arg1 : i32, i32
  }
}

</mosaic_0001>

<bundles_post_ra>
// kernel: logit_forward.1
= control target key start
LH: loop header
LB: loop body
LE: loop exit
PB: predicated region body
PF: predicated region fallthrough
CT: control target
= control target key end

     0   :  { %s515_s1 = inlined_call_operand.vmem [shape: bf16[256,256], index: 1, kind: input, shape index: {}]   ;;  %s516_s0 = inlined_call_operand.vmem [shape: bf16[16,256], index: 0, kind: input, shape index: {}]   ;;  %s517_s2 = inlined_call_operand.vmem [shape: bf16[16,256], index: 2, kind: output, shape index: {}]  }
   0x1   :  { %v341_v0 = vld [vmem:[%s515_s1 + $0x4] ss:$8 sps:$4 sm:$0xff]   ;;  %v343_v1 = vld [vmem:[%s515_s1] ss:$8 sps:$4 sm:$0xff]   ;;  %v344_v2 = vld [vmem:[%s515_s1 + $0x14] ss:$8 sps:$4 sm:$0xff]  }
   0x2   :  { %227 = vmatprep.subr.bf16.mxu0 %v341_v0  ;;  %v346_v3 = vld [vmem:[%s515_s1 + $0x10] ss:$8 sps:$4 sm:$0xff]   ;;  %v347_v4 = vld [vmem:[%s515_s1 + $0x24] ss:$8 sps:$4 sm:$0xff]   ;;  %v349_v5 = vld [vmem:[%s515_s1 + $0x20] ss:$8 sps:$4 sm:$0xff]  }
   0x3   :  { %228 = vmatpush1.bf16.msra.mxu0 %v343_v1  ;;  %v350_v6 = vld [vmem:[%s515_s1 + $0x34] ss:$8 sps:$4 sm:$0xff]   ;;  %v352_v7 = vld [vmem:[%s515_s1 + $0x30] ss:$8 sps:$4 sm:$0xff]   ;;  %v353_v8 = vld [vmem:[%s515_s1 + $0x44] ss:$8 sps:$4 sm:$0xff]  }
   0x4   :  { %229 = vmatprep.subr.bf16.mxu0 %v344_v2  ;;  %v355_v9 = vld [vmem:[%s515_s1 + $0x40] ss:$8 sps:$4 sm:$0xff]   ;;  %v356_v10 = vld [vmem:[%s515_s1 + $0x54] ss:$8 sps:$4 sm:$0xff]   ;;  %v358_v11 = vld [vmem:[%s515_s1 + $0x50] ss:$8 sps:$4 sm:$0xff]  }
   0x5   :  { %v359_v12 = vld [vmem:[%s515_s1 + $0x64] ss:$8 sps:$4 sm:$0xff]   ;;  %v361_v14 = vld [vmem:[%s515_s1 + $0x60] ss:$8 sps:$4 sm:$0xff]   ;;  %v362_v15 = vld [vmem:[%s515_s1 + $0x74] ss:$8 sps:$4 sm:$0xff]  }
   0x6   :  { %v391_v13 = vld [vmem:[%s516_s0 + $0x4] ss:$8 sps:$4 sm:$0xff]   ;;  %v364_v16 = vld [vmem:[%s515_s1 + $0x70] ss:$8 sps:$4 sm:$0xff]   ;;  %v367_v18 = vld [vmem:[%s515_s1 + $0x80] ss:$8 sps:$4 sm:$0xff]  }
   0x7   :  { %230 = vmatpush1.bf16.msra.mxu0 %v346_v3  ;;  %259 = vmatprep.mubr.bf16.mxu0 %v391_v13  ;;  %v365_v17 = vld [vmem:[%s515_s1 + $0x84] ss:$8 sps:$4 sm:$0xff]   ;;  %v368_v19 = vld [vmem:[%s515_s1 + $0x94] ss:$8 sps:$4 sm:$0xff]   ;;  %v370_v20 = vld [vmem:[%s515_s1 + $0x90] ss:$8 sps:$4 sm:$0xff]  }
   0x8   :  { %231 = vmatprep.subr.bf16.mxu0 %v347_v4  ;;  %v371_v21 = vld [vmem:[%s515_s1 + $0xa4] ss:$8 sps:$4 sm:$0xff]   ;;  %v373_v22 = vld [vmem:[%s515_s1 + $0xa0] ss:$8 sps:$4 sm:$0xff]   ;;  %v374_v23 = vld [vmem:[%s515_s1 + $0xb4] ss:$8 sps:$4 sm:$0xff]  }
   0x9   :  { %v376_v24 = vld [vmem:[%s515_s1 + $0xb0] ss:$8 sps:$4 sm:$0xff]   ;;  %v377_v25 = vld [vmem:[%s515_s1 + $0xc4] ss:$8 sps:$4 sm:$0xff]   ;;  %v379_v26 = vld [vmem:[%s515_s1 + $0xc0] ss:$8 sps:$4 sm:$0xff]  }
   0xa   :  { %v380_v27 = vld [vmem:[%s515_s1 + $0xd4] ss:$8 sps:$4 sm:$0xff]   ;;  %v382_v28 = vld [vmem:[%s515_s1 + $0xd0] ss:$8 sps:$4 sm:$0xff]   ;;  %v383_v29 = vld [vmem:[%s515_s1 + $0xe4] ss:$8 sps:$4 sm:$0xff]  }
   0xb   :  { %232 = vmatpush1.bf16.msra.mxu0 %v349_v5  ;;  %v385_v30 = vld [vmem:[%s515_s1 + $0xe0] ss:$8 sps:$4 sm:$0xff]   ;;  %v386_v31 = vld [vmem:[%s515_s1 + $0xf4] ss:$8 sps:$4 sm:$0xff]   ;;  %v388_v32 = vld [vmem:[%s515_s1 + $0xf0] ss:$8 sps:$4 sm:$0xff]  }
   0xc   :  { %233 = vmatprep.subr.bf16.mxu0 %v350_v6  ;;  %v389_v33 = vld [vmem:[%s516_s0] ss:$8 sps:$4 sm:$0xff]  }
   0xf   :  { %234 = vmatpush1.bf16.msra.mxu0 %v352_v7 }
  0x10   :  { %235 = vmatprep.subr.bf16.mxu0 %v353_v8 }
  0x13   :  { %236 = vmatpush1.bf16.msra.mxu0 %v355_v9 }
  0x14   :  { %237 = vmatprep.subr.bf16.mxu0 %v356_v10 }
  0x17   :  { %238 = vmatpush1.bf16.msra.mxu0 %v358_v11 }
  0x18   :  { %239 = vmatprep.subr.bf16.mxu0 %v359_v12 }
  0x1b   :  { %240 = vmatpush1.bf16.msra.mxu0 %v361_v14 }
  0x1c   :  { %241 = vmatprep.subr.bf16.mxu0 %v362_v15 }
  0x1f   :  { %242 = vmatpush1.bf16.msra.mxu0 %v364_v16 }
  0x20   :  { %243 = vmatprep.subr.bf16.mxu0 %v365_v17 }
  0x23   :  { %244 = vmatpush1.bf16.msra.mxu0 %v367_v18 }
  0x24   :  { %245 = vmatprep.subr.bf16.mxu0 %v368_v19 }
  0x27   :  { %246 = vmatpush1.bf16.msra.mxu0 %v370_v20 }
  0x28   :  { %247 = vmatprep.subr.bf16.mxu0 %v371_v21 }
  0x2b   :  { %248 = vmatpush1.bf16.msra.mxu0 %v373_v22 }
  0x2c   :  { %249 = vmatprep.subr.bf16.mxu0 %v374_v23 }
  0x2f   :  { %250 = vmatpush1.bf16.msra.mxu0 %v376_v24 }
  0x30   :  { %251 = vmatprep.subr.bf16.mxu0 %v377_v25 }
  0x33   :  { %252 = vmatpush1.bf16.msra.mxu0 %v379_v26 }
  0x34   :  { %253 = vmatprep.subr.bf16.mxu0 %v380_v27 }
  0x37   :  { %254 = vmatpush1.bf16.msra.mxu0 %v382_v28 }
  0x38   :  { %255 = vmatprep.subr.bf16.mxu0 %v383_v29 }
  0x3b   :  { %256 = vmatpush1.bf16.msra.mxu0 %v385_v30 }
  0x3c   :  { %257 = vmatprep.subr.bf16.mxu0 %v386_v31 }
  0x3f   :  { %258 = vmatpush1.bf16.msra.mxu0 %v388_v32 }
  0x42   :  { %260 = vmatmul.mubr.bf16.vlgmr.msra.gmra.mrb[0].mxu0 %v389_v33 }
 0x115   :  { %v261_v34 = vpop.f32.mrb[0].mxu0 }
 0x116   :  { %v263_v35 = vpop.f32.mrb[1].mxu0 }
 0x117   :  { %v339_v36 = vpack.c.bf16 %v263_v35, %v261_v34  ;;  %v265_v37 = vpop.f32.mrb[2].mxu0 }
 0x118   :  { %v267_v38 = vpop.f32.mrb[3].mxu0 }
 0x119   :  { %297 = vst [vmem:[%s517_s2] sm:$0xff] %v339_v36  ;;  %v340_v39 = vpack.c.bf16 %v267_v38, %v265_v37 }
 0x11b   :  { %298 = vst [vmem:[%s517_s2 + $0x8] sm:$0xff] %v340_v39 }

</bundles_post_ra>
